<compile_context>
chip_gen: v7x
topology: tpu7x:2x2x1
jax: 0.10.0
libtpu: 0.0.40
codegen_flags: <defaults>
</compile_context>

<pallas_src>
import jax
import jax.numpy as jnp
from jax.experimental import pallas as pl
from jax.experimental.pallas import tpu as pltpu


# ----------------------------------------------------------------------------
# Kernels
# ----------------------------------------------------------------------------
def _aff_resident_kernel(x_ref, r_ref, w1l_ref, b1l_ref, w2l_ref, b2l_ref,
                         w1g_ref, b1g_ref, w2g_ref, b2g_ref, o_ref):
    """One whole (C, HW) image per grid step; global branch computed in-kernel."""
    x = x_ref[0].astype(jnp.float32)                       # (C, HW)
    r = r_ref[0].astype(jnp.float32)                       # (C, HW)
    xa = x + r

    # Global branch: AdaptiveAvgPool(1) -> conv1x1+BN -> ReLU -> conv1x1+BN,
    # all on a (C, 1) column.  Doing it here means x / r are read from HBM
    # exactly once for the whole op.
    pooled = jnp.mean(xa, axis=1, keepdims=True)           # (C, 1)
    hg = jnp.dot(w1g_ref[...], pooled,
                 preferred_element_type=jnp.float32) + b1g_ref[...]
    hg = jnp.maximum(hg, 0.0)                              # (Cr, 1)
    xg = jnp.dot(w2g_ref[...], hg,
                 preferred_element_type=jnp.float32) + b2g_ref[...]   # (C, 1)

    # Local branch: conv1x1+BN -> ReLU -> conv1x1+BN as channel matmuls.
    h = jnp.dot(w1l_ref[...], xa,
                preferred_element_type=jnp.float32) + b1l_ref[...]
    h = jnp.maximum(h, 0.0)                                # (Cr, HW)
    z = jnp.dot(w2l_ref[...], h,
                preferred_element_type=jnp.float32) + b2l_ref[...] + xg

    # sigmoid(z) with one transcendental.
    wei = 0.5 * jnp.tanh(0.5 * z) + 0.5
    # 2*x*wei + 2*r*(1-wei) == 2*(r + (x - r)*wei)
    o_ref[0] = (2.0 * (r + (x - r) * wei)).astype(o_ref.dtype)


def _aff_tiled_kernel(x_ref, r_ref, w1_ref, b1_ref, w2_ref, b2xg_ref, o_ref):
    """One (C, T) HW tile per grid step; xg pre-folded into the conv2 bias."""
    x = x_ref[0].astype(jnp.float32)                       # (C, T)
    r = r_ref[0].astype(jnp.float32)                       # (C, T)
    xa = x + r

    h = jnp.dot(w1_ref[...], xa,
                preferred_element_type=jnp.float32) + b1_ref[...]
    h = jnp.maximum(h, 0.0)                                # (Cr, T)
    z = jnp.dot(w2_ref[...], h,
                preferred_element_type=jnp.float32) + b2xg_ref[0]   # bias + xg

    wei = 0.5 * jnp.tanh(0.5 * z) + 0.5                    # sigmoid, 1 transcendental
    o_ref[0] = (2.0 * (r + (x - r) * wei)).astype(o_ref.dtype)


# ----------------------------------------------------------------------------
# VMEM budgeting / tile selection
# ----------------------------------------------------------------------------
def _vmem_capacity_bytes():
    try:
        info = pltpu.get_tpu_info()
        cap = getattr(info, "vmem_capacity_bytes", None)
        if cap:
            return int(cap)
    except Exception:
        pass
    return 64 * 1024 * 1024        # conservative default (v7x per-core VMEM)


def _vmem_budgets():
    cap = _vmem_capacity_bytes()
    # Keep the per-step activation working set well under the scoped limit so
    # the pipeline stays double-buffered on every generation (v7x: 64 MiB).
    act_budget = min(int(cap * 0.45), 48 * 1024 * 1024)
    vmem_limit = min(int(cap * 0.85), 110 * 1024 * 1024)
    return act_budget, vmem_limit


def _pick_hw_tile(hw, n_batch, per_col_bytes, act_budget):
    """Largest lane-dense HW tile whose pipelined working set fits the budget."""
    if hw <= 128:
        return hw                                          # full-dim block
    tile_max = max(128, (act_budget // per_col_bytes) // 128 * 128)
    tile_max = min(tile_max, 16384)
    if tile_max >= hw and hw % 128 == 0:
        tile = hw
    else:
        tile = min(tile_max, (hw // 128) * 128)
        # Prefer an exact divisor (no masked tail) when it is close in size.
        t = tile
        while t >= 128:
            if hw % t == 0:
                if 2 * t >= tile:
                    tile = t
                break
            t -= 128
    # v7x shards parallel grid axes across its 2 TensorCores: if both grid
    # axes are odd-sized, split HW further so neither core sits idle.
    if n_batch % 2 == 1 and pl.cdiv(hw, tile) % 2 == 1 and tile >= 256:
        tile = max(128, ((tile // 2) // 128) * 128)
    return tile


# ----------------------------------------------------------------------------
# Forward wrapper
# ----------------------------------------------------------------------------
def aff_forward(x_nchw, res_nchw, folded_params, force_tiled=False):
    """AFF forward.  Wrap in jax.jit so the (tiled-path) prologue fuses.

    x_nchw, res_nchw: (N, C, H, W); kernel I/O dtype == input dtype
        (pass bf16 inputs to get bf16 HBM bandwidth), in-kernel math is f32.
    folded_params: (W1l, b1l, W2l, b2l, W1g, b1g, W2g, b2g) with eval-mode BN
        folded in; W1* is (C//16, C), W2* is (C, C//16), biases (·, 1).
    """
    N, C, H, W = x_nchw.shape
    HW = H * W
    W1l, b1l, W2l, b2l, W1g, b1g, W2g, b2g = folded_params
    Cr = W1l.shape[0]

    io_dtype = jnp.promote_types(x_nchw.dtype, res_nchw.dtype)
    itemsize = jnp.dtype(io_dtype).itemsize

    # Free reshape; astype is a no-op when dtypes already match (no extra pass).
    x_flat = x_nchw.reshape(N, C, HW).astype(io_dtype)
    r_flat = res_nchw.reshape(N, C, HW).astype(io_dtype)

    act_budget, vmem_limit = _vmem_budgets()
    # VMEM bytes per lane column of a block: double-buffered x/r/out streams
    # plus an allowance (~8 f32 temporaries) for in-kernel intermediates.
    per_col = C * (6 * itemsize + 32)
    param_bytes = int(sum(int(p.size) * 4 for p in folded_params))

    use_resident = (not force_tiled) and (HW * per_col <= act_budget)

    if use_resident:
        # ---- resident path: 3 HBM passes total, pooling done in-kernel ----
        data_spec = pl.BlockSpec((1, C, HW), lambda n: (n, 0, 0))
        const = lambda n: (0, 0)
        out_flat = pl.pallas_call(
            _aff_resident_kernel,
            out_shape=jax.ShapeDtypeStruct((N, C, HW), io_dtype),
            grid_spec=pltpu.PrefetchScalarGridSpec(
                num_scalar_prefetch=0,
                grid=(N,),
                in_specs=[
                    data_spec,                          # x
                    data_spec,                          # residual
                    pl.BlockSpec((Cr, C), const),       # W1 local
                    pl.BlockSpec((Cr, 1), const),       # b1 local
                    pl.BlockSpec((C, Cr), const),       # W2 local
                    pl.BlockSpec((C, 1), const),        # b2 local
                    pl.BlockSpec((Cr, C), const),       # W1 global
                    pl.BlockSpec((Cr, 1), const),       # b1 global
                    pl.BlockSpec((C, Cr), const),       # W2 global
                    pl.BlockSpec((C, 1), const),        # b2 global
                ],
                out_specs=data_spec,
            ),
            compiler_params=pltpu.CompilerParams(
                dimension_semantics=("parallel",),
                vmem_limit_bytes=vmem_limit),
            cost_estimate=pl.CostEstimate(
                flops=int(4 * N * HW * C * Cr + 10 * N * HW * C + 8 * N * C * Cr),
                transcendentals=int(N * HW * C),
                bytes_accessed=int(3 * N * C * HW * itemsize + param_bytes)),
        )(x_flat, r_flat, W1l, b1l, W2l, b2l, W1g, b1g, W2g, b2g)
        return out_flat.reshape(N, C, H, W)

    # ---- tiled path: HW tiled on a second parallel axis ---------------------
    # Global branch as a fused XLA prologue: cast + add + reduce fuse into one
    # read of x and r; the tiny MLP output xg is folded into the conv2 bias so
    # the kernel has one fewer input stream and no per-block broadcast add.
    pooled = jnp.mean(x_flat.astype(jnp.float32) + r_flat.astype(jnp.float32),
                      axis=2)                                         # (N, C)
    hg = jnp.maximum(pooled @ W1g.T + b1g[:, 0], 0.0)                 # (N, Cr)
    xg = hg @ W2g.T + b2g[:, 0]                                       # (N, C)
    b2_comb = (b2l[None, :, :] + xg[:, :, None]).astype(jnp.float32)  # (N, C, 1)

    hw_tile = _pick_hw_tile(HW, N, per_col, act_budget)
    grid = (N, pl.cdiv(HW, hw_tile))

    data_spec = pl.BlockSpec((1, C, hw_tile), lambda n, t: (n, 0, t))
    const2 = lambda n, t: (0, 0)

    out_flat = pl.pallas_call(
        _aff_tiled_kernel,
        out_shape=jax.ShapeDtypeStruct((N, C, HW), io_dtype),
        grid_spec=pltpu.PrefetchScalarGridSpec(
            num_scalar_prefetch=0,
            grid=grid,
            in_specs=[
                data_spec,                                        # x
                data_spec,                                        # residual
                pl.BlockSpec((Cr, C), const2),                    # W1 local
                pl.BlockSpec((Cr, 1), const2),                    # b1 local
                pl.BlockSpec((C, Cr), const2),                    # W2 local
                pl.BlockSpec((1, C, 1), lambda n, t: (n, 0, 0)),  # b2 + xg (per batch)
            ],
            out_specs=data_spec,
        ),
        compiler_params=pltpu.CompilerParams(
            dimension_semantics=("parallel", "parallel"),
            vmem_limit_bytes=vmem_limit),
        cost_estimate=pl.CostEstimate(
            flops=int(4 * N * HW * C * Cr + 10 * N * HW * C),
            transcendentals=int(N * HW * C),
            bytes_accessed=int(3 * N * C * HW * itemsize + param_bytes
                               + N * C * 4)),
    )(x_flat, r_flat, W1l, b1l, W2l, b2_comb)
    return out_flat.reshape(N, C, H, W)


# ----------------------------------------------------------------------------
# Parameter folding / synthesis / reference
# ----------------------------------------------------------------------------
def fold_conv_bn(conv_w, conv_b, gamma, beta, mean, var, eps=1e-5):
    """Fold eval-mode BatchNorm into a 1x1 conv (eps matches nn.BatchNorm2d default).

    conv_w: (out, in), conv_b: (out,).  Returns W_eff (out, in) and b_eff
    (out, 1) so y = W_eff @ x + b_eff (channels-first) == BN(conv(x)).
    """
    scale = gamma / jnp.sqrt(var + eps)                  # (out,)
    w_eff = conv_w * scale[:, None]                      # (out, in)
    b_eff = (scale * (conv_b - mean) + beta)[:, None]    # (out, 1)
    return w_eff.astype(jnp.float32), b_eff.astype(jnp.float32)


def make_params(key, channels):
    """Deterministic synthetic parameters matching AFF(channels).__init__ shapes."""
    cr = channels // 16
    keys = jax.random.split(key, 16)

    def branch(ks):
        w1 = jax.random.normal(ks[0], (cr, channels), jnp.float32) * 0.1
        b1 = jax.random.normal(ks[1], (cr,), jnp.float32) * 0.1
        g1 = 1.0 + 0.1 * jax.random.normal(ks[2], (cr,), jnp.float32)
        be1 = 0.1 * jax.random.normal(ks[3], (cr,), jnp.float32)
        m1 = 0.1 * jax.random.normal(ks[4], (cr,), jnp.float32)
        v1 = 1.0 + 0.1 * jax.random.uniform(ks[5], (cr,), jnp.float32)
        w2 = jax.random.normal(ks[6], (channels, cr), jnp.float32) * 0.1
        b2 = jax.random.normal(ks[7], (channels,), jnp.float32) * 0.1
        g2 = 1.0 + 0.1 * jax.random.normal(ks[0], (channels,), jnp.float32)
        be2 = 0.1 * jax.random.normal(ks[1], (channels,), jnp.float32)
        m2 = 0.1 * jax.random.normal(ks[2], (channels,), jnp.float32)
        v2 = 1.0 + 0.1 * jax.random.uniform(ks[3], (channels,), jnp.float32)
        W1, B1 = fold_conv_bn(w1, b1, g1, be1, m1, v1)
        W2, B2 = fold_conv_bn(w2, b2, g2, be2, m2, v2)
        return W1, B1, W2, B2

    W1l, B1l, W2l, B2l = branch(keys[:8])
    W1g, B1g, W2g, B2g = branch(keys[8:])
    return (W1l, B1l, W2l, B2l, W1g, B1g, W2g, B2g)


def aff_reference(x, r, params):
    """Pure-JAX reference (same folded params), channels-first, f32."""
    W1l, b1l, W2l, b2l, W1g, b1g, W2g, b2g = params
    N, C, H, W = x.shape
    HW = H * W
    xa = (x + r).reshape(N, C, HW)
    h = jnp.maximum(jnp.einsum('oc,nch->noh', W1l, xa) + b1l[None], 0.0)
    xl = jnp.einsum('co,noh->nch', W2l, h) + b2l[None]
    pooled = jnp.mean(xa, axis=2)                                  # (N, C)
    hg = jnp.maximum(pooled @ W1g.T + b1g[:, 0], 0.0)
    xg = (hg @ W2g.T + b2g[:, 0])[:, :, None]                      # (N, C, 1)
    wei = jax.nn.sigmoid(xl + xg)
    x_m = x.reshape(N, C, HW)
    r_m = r.reshape(N, C, HW)
    out = 2.0 * x_m * wei + 2.0 * r_m * (1.0 - wei)
    return out.reshape(N, C, H, W)


if __name__ == "__main__":
    # channels must be >= 16 (channels // 16 bottleneck); 64 -> bottleneck 4.
    N, C, H, W = 2, 64, 16, 16
    key = jax.random.PRNGKey(0)
    kx, kr, kp = jax.random.split(key, 3)
    x = jax.random.normal(kx, (N, C, H, W), jnp.float32)
    residual = jax.random.normal(kr, (N, C, H, W), jnp.float32)
    params = make_params(kp, C)

    aff_fn = jax.jit(aff_forward, static_argnames=("force_tiled",))

    ref = aff_reference(x, residual, params)

    # Resident path (global branch pooled in-kernel): default for small images.
    out = jax.block_until_ready(aff_fn(x, residual, params))
    assert out.shape == (N, C, H, W)
    assert jnp.allclose(out, ref, atol=1e-4, rtol=1e-4), "resident f32 mismatch"

    # Tiled path (forced) on the same input for coverage.
    out_t = jax.block_until_ready(aff_fn(x, residual, params, force_tiled=True))
    assert jnp.allclose(out_t, ref, atol=1e-4, rtol=1e-4), "tiled f32 mismatch"

    # Ragged spatial extent (HW = 144, not a multiple of 128), both paths.
    H2 = W2 = 12
    x2 = jax.random.normal(kx, (N, C, H2, W2), jnp.float32)
    r2 = jax.random.normal(kr, (N, C, H2, W2), jnp.float32)
    ref2 = aff_reference(x2, r2, params)
    out2 = jax.block_until_ready(aff_fn(x2, r2, params))
    out2t = jax.block_until_ready(aff_fn(x2, r2, params, force_tiled=True))
    assert jnp.allclose(out2, ref2, atol=1e-4, rtol=1e-4), "resident ragged mismatch"
    assert jnp.allclose(out2t, ref2, atol=1e-4, rtol=1e-4), "tiled ragged mismatch"

    # bf16-native inputs (no wrapper cast); in-kernel math stays f32.
    x_bf = x.astype(jnp.bfloat16)
    r_bf = residual.astype(jnp.bfloat16)
    ref_bf = aff_reference(x_bf.astype(jnp.float32), r_bf.astype(jnp.float32), params)
    out_bf = jax.block_until_ready(aff_fn(x_bf, r_bf, params))
    assert out_bf.dtype == jnp.bfloat16
    assert jnp.allclose(out_bf.astype(jnp.float32), ref_bf, atol=6e-2, rtol=6e-2), \
        "bf16 mismatch"

    print("KERNEL_OK")
</pallas_src>

<mosaic_0001>
module attributes {stable_mosaic.version = 11 : i64} {
  func.func @_aff_resident_kernel(%arg0: i32, %arg1: memref<1x64x256xf32, #tpu.memory_space<vmem>>, %arg2: memref<1x64x256xf32, #tpu.memory_space<vmem>>, %arg3: memref<4x64xf32, #tpu.memory_space<vmem>>, %arg4: memref<4x1xf32, #tpu.memory_space<vmem>>, %arg5: memref<64x4xf32, #tpu.memory_space<vmem>>, %arg6: memref<64x1xf32, #tpu.memory_space<vmem>>, %arg7: memref<4x64xf32, #tpu.memory_space<vmem>>, %arg8: memref<4x1xf32, #tpu.memory_space<vmem>>, %arg9: memref<64x4xf32, #tpu.memory_space<vmem>>, %arg10: memref<64x1xf32, #tpu.memory_space<vmem>>, %arg11: memref<1x64x256xf32, #tpu.memory_space<vmem>>) attributes {dimension_semantics = [#tpu.dimension_semantics<parallel>], iteration_bounds = array<i64: 2>, scalar_prefetch = 0 : i64, scratch_operands = 0 : i64, tpu.core_type = #tpu.core_type<tc>, window_params = [{transform_indices = @transform_0, window_bounds = array<i64: 1, 64, 256>}, {transform_indices = @transform_1, window_bounds = array<i64: 1, 64, 256>}, {pipeline_mode = #tpu.pipeline_mode<synchronous>, transform_indices = @transform_2, window_bounds = array<i64: 4, 64>}, {pipeline_mode = #tpu.pipeline_mode<synchronous>, transform_indices = @transform_3, window_bounds = array<i64: 4, 1>}, {pipeline_mode = #tpu.pipeline_mode<synchronous>, transform_indices = @transform_4, window_bounds = array<i64: 64, 4>}, {pipeline_mode = #tpu.pipeline_mode<synchronous>, transform_indices = @transform_5, window_bounds = array<i64: 64, 1>}, {pipeline_mode = #tpu.pipeline_mode<synchronous>, transform_indices = @transform_6, window_bounds = array<i64: 4, 64>}, {pipeline_mode = #tpu.pipeline_mode<synchronous>, transform_indices = @transform_7, window_bounds = array<i64: 4, 1>}, {pipeline_mode = #tpu.pipeline_mode<synchronous>, transform_indices = @transform_8, window_bounds = array<i64: 64, 4>}, {pipeline_mode = #tpu.pipeline_mode<synchronous>, transform_indices = @transform_9, window_bounds = array<i64: 64, 1>}, {transform_indices = @transform_10, window_bounds = array<i64: 1, 64, 256>}]} {
    %c0 = arith.constant 0 : index
    %c0_0 = arith.constant 0 : index
    %c0_1 = arith.constant 0 : index
    %0 = vector.load %arg1[%c0, %c0_0, %c0_1] : memref<1x64x256xf32, #tpu.memory_space<vmem>>, vector<1x64x256xf32>
    %1 = vector.shape_cast %0 : vector<1x64x256xf32> to vector<64x256xf32>
    %c0_2 = arith.constant 0 : index
    %c0_3 = arith.constant 0 : index
    %c0_4 = arith.constant 0 : index
    %2 = vector.load %arg2[%c0_2, %c0_3, %c0_4] : memref<1x64x256xf32, #tpu.memory_space<vmem>>, vector<1x64x256xf32>
    %3 = vector.shape_cast %2 : vector<1x64x256xf32> to vector<64x256xf32>
    %4 = arith.addf %1, %3 : vector<64x256xf32>
    %cst = arith.constant dense<0.000000e+00> : vector<64xf32>
    %5 = vector.multi_reduction <add>, %4, %cst [1] : vector<64x256xf32> to vector<64xf32>
    %6 = vector.shape_cast %5 : vector<64xf32> to vector<64x1xf32>
    %cst_5 = arith.constant 2.560000e+02 : f32
    %7 = vector.broadcast %cst_5 : f32 to vector<64x1xf32>
    %8 = arith.divf %6, %7 : vector<64x1xf32>
    %c0_6 = arith.constant 0 : index
    %c0_7 = arith.constant 0 : index
    %9 = vector.load %arg7[%c0_6, %c0_7] : memref<4x64xf32, #tpu.memory_space<vmem>>, vector<4x64xf32>
    %cst_8 = arith.constant dense<0.000000e+00> : vector<4x1xf32>
    %10 = tpu.matmul %9, %8, %cst_8 {dimension_numbers = #tpu.dot_dimension_numbers<[1], [0], [0], [1], [0, 0, 1, 1], [], []>} : vector<4x64xf32>, vector<64x1xf32>, vector<4x1xf32> -> vector<4x1xf32>
    %c0_9 = arith.constant 0 : index
    %c0_10 = arith.constant 0 : index
    %11 = vector.load %arg8[%c0_9, %c0_10] : memref<4x1xf32, #tpu.memory_space<vmem>>, vector<4x1xf32>
    %12 = arith.addf %10, %11 : vector<4x1xf32>
    %cst_11 = arith.constant 0.000000e+00 : f32
    %13 = vector.broadcast %cst_11 : f32 to vector<4x1xf32>
    %14 = arith.maximumf %12, %13 : vector<4x1xf32>
    %c0_12 = arith.constant 0 : index
    %c0_13 = arith.constant 0 : index
    %15 = vector.load %arg9[%c0_12, %c0_13] : memref<64x4xf32, #tpu.memory_space<vmem>>, vector<64x4xf32>
    %cst_14 = arith.constant dense<0.000000e+00> : vector<64x1xf32>
    %16 = tpu.matmul %15, %14, %cst_14 {dimension_numbers = #tpu.dot_dimension_numbers<[1], [0], [0], [1], [0, 0, 1, 1], [], []>} : vector<64x4xf32>, vector<4x1xf32>, vector<64x1xf32> -> vector<64x1xf32>
    %c0_15 = arith.constant 0 : index
    %c0_16 = arith.constant 0 : index
    %17 = vector.load %arg10[%c0_15, %c0_16] : memref<64x1xf32, #tpu.memory_space<vmem>>, vector<64x1xf32>
    %18 = arith.addf %16, %17 : vector<64x1xf32>
    %c0_17 = arith.constant 0 : index
    %c0_18 = arith.constant 0 : index
    %19 = vector.load %arg3[%c0_17, %c0_18] : memref<4x64xf32, #tpu.memory_space<vmem>>, vector<4x64xf32>
    %cst_19 = arith.constant dense<0.000000e+00> : vector<4x256xf32>
    %20 = tpu.matmul %19, %4, %cst_19 {dimension_numbers = #tpu.dot_dimension_numbers<[1], [0], [0], [1], [0, 0, 1, 1], [], []>} : vector<4x64xf32>, vector<64x256xf32>, vector<4x256xf32> -> vector<4x256xf32>
    %c0_20 = arith.constant 0 : index
    %c0_21 = arith.constant 0 : index
    %21 = vector.load %arg4[%c0_20, %c0_21] : memref<4x1xf32, #tpu.memory_space<vmem>>, vector<4x1xf32>
    %22 = vector.broadcast %21 : vector<4x1xf32> to vector<4x256xf32>
    %23 = arith.addf %20, %22 : vector<4x256xf32>
    %cst_22 = arith.constant 0.000000e+00 : f32
    %24 = vector.broadcast %cst_22 : f32 to vector<4x256xf32>
    %25 = arith.maximumf %23, %24 : vector<4x256xf32>
    %c0_23 = arith.constant 0 : index
    %c0_24 = arith.constant 0 : index
    %26 = vector.load %arg5[%c0_23, %c0_24] : memref<64x4xf32, #tpu.memory_space<vmem>>, vector<64x4xf32>
    %cst_25 = arith.constant dense<0.000000e+00> : vector<64x256xf32>
    %27 = tpu.matmul %26, %25, %cst_25 {dimension_numbers = #tpu.dot_dimension_numbers<[1], [0], [0], [1], [0, 0, 1, 1], [], []>} : vector<64x4xf32>, vector<4x256xf32>, vector<64x256xf32> -> vector<64x256xf32>
    %c0_26 = arith.constant 0 : index
    %c0_27 = arith.constant 0 : index
    %28 = vector.load %arg6[%c0_26, %c0_27] : memref<64x1xf32, #tpu.memory_space<vmem>>, vector<64x1xf32>
    %29 = vector.broadcast %28 : vector<64x1xf32> to vector<64x256xf32>
    %30 = arith.addf %27, %29 : vector<64x256xf32>
    %31 = vector.broadcast %18 : vector<64x1xf32> to vector<64x256xf32>
    %32 = arith.addf %30, %31 : vector<64x256xf32>
    %cst_28 = arith.constant 5.000000e-01 : f32
    %33 = vector.broadcast %cst_28 : f32 to vector<64x256xf32>
    %34 = arith.mulf %33, %32 : vector<64x256xf32>
    %35 = math.tanh %34 : vector<64x256xf32>
    %cst_29 = arith.constant 5.000000e-01 : f32
    %36 = vector.broadcast %cst_29 : f32 to vector<64x256xf32>
    %37 = arith.mulf %36, %35 : vector<64x256xf32>
    %cst_30 = arith.constant 5.000000e-01 : f32
    %38 = vector.broadcast %cst_30 : f32 to vector<64x256xf32>
    %39 = arith.addf %37, %38 : vector<64x256xf32>
    %40 = arith.subf %1, %3 : vector<64x256xf32>
    %41 = arith.mulf %40, %39 : vector<64x256xf32>
    %42 = arith.addf %3, %41 : vector<64x256xf32>
    %cst_31 = arith.constant 2.000000e+00 : f32
    %43 = vector.broadcast %cst_31 : f32 to vector<64x256xf32>
    %44 = arith.mulf %43, %42 : vector<64x256xf32>
    %c0_32 = arith.constant 0 : index
    %c0_33 = arith.constant 0 : index
    %c0_34 = arith.constant 0 : index
    %45 = vector.load %arg11[%c0_32, %c0_33, %c0_34] : memref<1x64x256xf32, #tpu.memory_space<vmem>>, vector<1x64x256xf32>
    %46 = vector.shape_cast %45 : vector<1x64x256xf32> to vector<64x256xf32>
    %47 = vector.shape_cast %44 : vector<64x256xf32> to vector<1x64x256xf32>
    tpu.vector_store %arg11[%c0_32, %c0_33, %c0_34], %47 {strides = array<i32>} : memref<1x64x256xf32, #tpu.memory_space<vmem>>, vector<1x64x256xf32>,
    return
  }
  func.func @transform_0(%arg0: i32) -> (i32, i32, i32) {
    %c0_i32 = arith.constant 0 : i32
    %c0_i32_0 = arith.constant 0 : i32
    %c0_i32_1 = arith.constant 0 : i32
    return %arg0, %c0_i32, %c0_i32_0 : i32, i32, i32
  }
  func.func @transform_1(%arg0: i32) -> (i32, i32, i32) {
    %c0_i32 = arith.constant 0 : i32
    %c0_i32_0 = arith.constant 0 : i32
    %c0_i32_1 = arith.constant 0 : i32
    return %arg0, %c0_i32, %c0_i32_0 : i32, i32, i32
  }
  func.func @transform_2(%arg0: i32) -> (i32, i32) {
    %c0_i32 = arith.constant 0 : i32
    %c0_i32_0 = arith.constant 0 : i32
    %c0_i32_1 = arith.constant 0 : i32
    return %c0_i32, %c0_i32_0 : i32, i32
  }
  func.func @transform_3(%arg0: i32) -> (i32, i32) {
    %c0_i32 = arith.constant 0 : i32
    %c0_i32_0 = arith.constant 0 : i32
    %c0_i32_1 = arith.constant 0 : i32
    return %c0_i32, %c0_i32_0 : i32, i32
  }
  func.func @transform_4(%arg0: i32) -> (i32, i32) {
    %c0_i32 = arith.constant 0 : i32
    %c0_i32_0 = arith.constant 0 : i32
    %c0_i32_1 = arith.constant 0 : i32
    return %c0_i32, %c0_i32_0 : i32, i32
  }
  func.func @transform_5(%arg0: i32) -> (i32, i32) {
    %c0_i32 = arith.constant 0 : i32
    %c0_i32_0 = arith.constant 0 : i32
    %c0_i32_1 = arith.constant 0 : i32
    return %c0_i32, %c0_i32_0 : i32, i32
  }
  func.func @transform_6(%arg0: i32) -> (i32, i32) {
    %c0_i32 = arith.constant 0 : i32
    %c0_i32_0 = arith.constant 0 : i32
    %c0_i32_1 = arith.constant 0 : i32
    return %c0_i32, %c0_i32_0 : i32, i32
  }
  func.func @transform_7(%arg0: i32) -> (i32, i32) {
    %c0_i32 = arith.constant 0 : i32
    %c0_i32_0 = arith.constant 0 : i32
    %c0_i32_1 = arith.constant 0 : i32
    return %c0_i32, %c0_i32_0 : i32, i32
  }
  func.func @transform_8(%arg0: i32) -> (i32, i32) {
    %c0_i32 = arith.constant 0 : i32
    %c0_i32_0 = arith.constant 0 : i32
    %c0_i32_1 = arith.constant 0 : i32
    return %c0_i32, %c0_i32_0 : i32, i32
  }
  func.func @transform_9(%arg0: i32) -> (i32, i32) {
    %c0_i32 = arith.constant 0 : i32
    %c0_i32_0 = arith.constant 0 : i32
    %c0_i32_1 = arith.constant 0 : i32
    return %c0_i32, %c0_i32_0 : i32, i32
  }
  func.func @transform_10(%arg0: i32) -> (i32, i32, i32) {
    %c0_i32 = arith.constant 0 : i32
    %c0_i32_0 = arith.constant 0 : i32
    %c0_i32_1 = arith.constant 0 : i32
    return %arg0, %c0_i32, %c0_i32_0 : i32, i32, i32
  }
}

</mosaic_0001>

<bundles_post_ra>
// kernel: aff_forward.1
= control target key start
LH: loop header
LB: loop body
LE: loop exit
PB: predicated region body
PF: predicated region fallthrough
CT: control target
= control target key end

     0   :  { %s1466_s13 = smov 0   ;;  %s1935_s0 = inlined_call_operand.vmem [shape: f32[2,64,256], index: 0, kind: input, shape index: {}]   ;;  %s1936_s1 = inlined_call_operand.vmem [shape: f32[2,64,256], index: 1, kind: input, shape index: {}]   ;;  %s1937_s2 = inlined_call_operand.vmem [shape: f32[4,64], index: 2, kind: input, shape index: {}]   ;;  %s1938_s3 = inlined_call_operand.vmem [shape: f32[4,1], index: 3, kind: input, shape index: {}]   ;;  %s1939_s4 = inlined_call_operand.vmem [shape: f32[64,4], index: 4, kind: input, shape index: {}]   ;;  %s1940_s5 = inlined_call_operand.vmem [shape: f32[64,1], index: 5, kind: input, shape index: {}]   ;;  %s1941_s6 = inlined_call_operand.vmem [shape: f32[4,64], index: 6, kind: input, shape index: {}]   ;;  %s1942_s7 = inlined_call_operand.vmem [shape: f32[4,1], index: 7, kind: input, shape index: {}]   ;;  %s1943_s8 = inlined_call_operand.vmem [shape: f32[64,4], index: 8, kind: input, shape index: {}]   ;;  %s1944_s9 = inlined_call_operand.vmem [shape: f32[64,1], index: 9, kind: input, shape index: {}]   ;;  %s1945_s10 = inlined_call_operand.vmem [shape: f32[2,64,256], index: 10, kind: output, shape index: {}]  }
   0x1 LB: > { %s1237_s14 = sadd.s32 4294967295, %s1405_s13   ;;  %p1241_p0 = scmp.ge.s32.totalorder %s1405_s13, 1  ;;  %s1405_s13 = sphi %s1466_s13, %s20_s13  }
   0x2   : > { %p322_p1 = scmp.lt.s32.totalorder %s1405_s13, 3 }
   0x4   : > { %p323_p2 = pnand %p1241_p0, %p322_p1 }
   0x6   : > { %326 = sbr.rel (%p323_p2) target bundleno = 917 (0x395), region = 60 }
   0xd   : > { %p365_p3 = scmp.lt.s32.totalorder %s1237_s14, 1  ;;  %v1407_v60 = vmov 0.0|0.0   ;;  %vm1408_vm0 = vmmov 0   ;;  %v1950_v61 = vmov 0.0   ;;  %vm463_vm1 = vcmask 523264  }
   0xe   : > { %1325 = vmatprep.subr.bf16.mxu1 %v1407_v60  ;;  %1308 = vmatprep.mubr.msk.f32.mxu1 %vm1408_vm0, %v1950_v61  ;;  %vm554_vm2 = vcmask 31744   ;;  %vm579_vm3 = vcmask 1043456  }
   0xf   : > { %s1971_s14 = smov (!%p365_p3, %s1237_s14), 1  ;;  %921 = vmatprep.mubr.f32.mxu0 %v1950_v61 }
  0x10   : > { %s1474_s15 = sshll.u32 %s1971_s14, 7 }
  0x11   : > { %s1480_s18 = scalar_lea.vmem %s1935_s0, %s1474_s15  ;;  %s1486_s21 = scalar_lea.vmem %s1936_s1, %s1474_s15 }
  0x12   : > { %v1489_v0 = vld [vmem:[%s1480_s18 + $0x20] sm:$0xff]  ;;  %v1492_v1 = vld [vmem:[%s1480_s18 + $0x28] sm:$0xff]  ;;  %v1521_v10 = vld [vmem:[%s1480_s18 + $0x30] sm:$0xff]  ;;  %s1865_s24 = scalar_lea.vmem %s1945_s10, %s1474_s15 }
  0x13   : > { %v1495_v2 = vld [vmem:[%s1486_s21 + $0x20] sm:$0xff]  ;;  %v1498_v3 = vld [vmem:[%s1486_s21 + $0x28] sm:$0xff]  ;;  %v1532_v13 = vld [vmem:[%s1480_s18 + $0x38] sm:$0xff] }
  0x14   : > { %v1502_v4 = vadd.f32 %v1495_v2, %v1489_v0  ;;  %v1505_v5 = vld [vmem:[%s1480_s18] sm:$0xff]  ;;  %v1508_v6 = vld [vmem:[%s1480_s18 + $0x8] sm:$0xff]  ;;  %v1512_v7 = vadd.f32 %v1498_v3, %v1492_v1  ;;  %v1535_v14 = vld [vmem:[%s1486_s21 + $0x30] sm:$0xff] }
  0x15   : > { %v1515_v8 = vld [vmem:[%s1486_s21] sm:$0xff]  ;;  %v1518_v9 = vld [vmem:[%s1486_s21 + $0x8] sm:$0xff]  ;;  %v1538_v15 = vld [vmem:[%s1486_s21 + $0x38] sm:$0xff]  ;;  %v1544_v17 = vadd.f32 %v1535_v14, %v1521_v10 }
  0x16   : > { %v1525_v11 = vadd.f32 %v1515_v8, %v1505_v5  ;;  %v1529_v12 = vadd.f32 %v1518_v9, %v1508_v6  ;;  %v434_v16 = vadd.f32 %v1512_v7, %v1502_v4  ;;  %v1548_v18 = vadd.f32 %v1538_v15, %v1532_v13  ;;  %v1551_v19 = vld [vmem:[%s1480_s18 + $0x10] sm:$0xff]  ;;  %v1554_v20 = vld [vmem:[%s1480_s18 + $0x18] sm:$0xff]  ;;  %v1589_v32 = vld [vmem:[%s1480_s18 + $0x40] sm:$0xff] }
  0x17   : > { %v1557_v21 = vld [vmem:[%s1486_s21 + $0x10] sm:$0xff]  ;;  %v1562_v23 = vld [vmem:[%s1486_s21 + $0x18] sm:$0xff]  ;;  %v1602_v36 = vld [vmem:[%s1480_s18 + $0x48] sm:$0xff] }
  0x18   : > { %v428_v22 = vadd.f32 %v1529_v12, %v1525_v11  ;;  %v1566_v24 = vadd.f32 %v1557_v21, %v1551_v19  ;;  %v1569_v25 = vld [vmem:[%s1480_s18 + $0x50] sm:$0xff]  ;;  %v1572_v26 = vld [vmem:[%s1480_s18 + $0x58] sm:$0xff]  ;;  %435 = vadd.xlane.f32.xlu1 %v434_v16  ;;  %v437_v27 = vadd.f32 %v1548_v18, %v1544_v17  ;;  %v1580_v29 = vadd.f32 %v1562_v23, %v1554_v20  ;;  %v1605_v37 = vld [vmem:[%s1486_s21 + $0x40] sm:$0xff] }
  0x19   : > { %v1583_v30 = vld [vmem:[%s1486_s21 + $0x50] sm:$0xff]  ;;  %v1586_v31 = vld [vmem:[%s1486_s21 + $0x58] sm:$0xff]  ;;  %v1608_v38 = vld [vmem:[%s1486_s21 + $0x48] sm:$0xff]  ;;  %v1614_v40 = vadd.f32 %v1605_v37, %v1589_v32 }
  0x1a   : > { %429 = vadd.xlane.f32.xlu0 %v428_v22  ;;  %v1595_v34 = vadd.f32 %v1583_v30, %v1569_v25  ;;  %v1599_v35 = vadd.f32 %v1586_v31, %v1572_v26  ;;  %v431_v39 = vadd.f32 %v1580_v29, %v1566_v24  ;;  %v1618_v41 = vadd.f32 %v1608_v38, %v1602_v36  ;;  %v1621_v42 = vld [vmem:[%s1480_s18 + $0x70] sm:$0xff]  ;;  %v1624_v43 = vld [vmem:[%s1480_s18 + $0x78] sm:$0xff]  ;;  %v1633_v46 = vld [vmem:[%s1480_s18 + $0x60] sm:$0xff] }
  0x1b   : > { %1955 = vst [vmem:[#allocation2_spill] sm:$0xff] %v1621_v42  ;;  %1956 = vst [vmem:[#allocation3_spill] sm:$0xff] %v1624_v43  ;;  %v1627_v44 = vld [vmem:[%s1486_s21 + $0x70] sm:$0xff]  ;;  %v1630_v45 = vld [vmem:[%s1486_s21 + $0x78] sm:$0xff] }
  0x1c   : > { %1957 = vst [vmem:[#allocation4_spill] sm:$0xff] %v1627_v44  ;;  %1958 = vst [vmem:[#allocation5_spill] sm:$0xff] %v1630_v45  ;;  %v1636_v47 = vld [vmem:[%s1480_s18 + $0x68] sm:$0xff]  ;;  %438 = vadd.xlane.f32.xlu1 %v437_v27  ;;  %v443_v48 = vadd.f32 %v1599_v35, %v1595_v34  ;;  %v1644_v50 = vadd.f32 %v1627_v44, %v1621_v42  ;;  %v1648_v51 = vadd.f32 %v1630_v45, %v1624_v43  ;;  %v1651_v52 = vld [vmem:[%s1486_s21 + $0x60] sm:$0xff] }
  0x1d   : > { %1959 = vst [vmem:[#allocation6_spill] sm:$0xff] %v1636_v47  ;;  %v1654_v53 = vld [vmem:[%s1486_s21 + $0x68] sm:$0xff]  ;;  %v440_v54 = vadd.f32 %v1618_v41, %v1614_v40  ;;  %v1660_v55 = vadd.f32 %v1651_v52, %v1633_v46 }
  0x1e   : > { %432 = vadd.xlane.f32.xlu0 %v431_v39  ;;  %v1664_v56 = vadd.f32 %v1654_v53, %v1636_v47  ;;  %v449_v58 = vadd.f32 %v1648_v51, %v1644_v50 }
  0x20   : > { %444 = vadd.xlane.f32.xlu1 %v443_v48  ;;  %v446_v59 = vadd.f32 %v1664_v56, %v1660_v55 }
  0x22   : > { %441 = vadd.xlane.f32.xlu0 %v440_v54 }
  0x24   : > { %450 = vadd.xlane.f32.xlu1 %v449_v58 }
  0x26   : > { %447 = vadd.xlane.f32.xlu0 %v446_v59 }
  0xa5   : > { %v436_v62 = vpop.xlane.xlu1 %435 }
  0xa6   : > { %v455_v48 = vmul.f32 0.00390625, %v436_v62  ;;  %v461_v62 = vld [vmem:[%s1941_s6] sm:$0xf] }
  0xa7   : > { %v430_v63 = vpop.xlane.xlu0 %429 }
  0xa8   : > { %v453_v27 = vmul.f32 0.00390625, %v430_v63 }
  0xa9   : > { %v439_v16 = vpop.xlane.xlu1 %438 }
  0xaa   : > { %v456_v54 = vmul.f32 0.00390625, %v439_v16 }
  0xab   : > { %v433_v22 = vpop.xlane.xlu0 %432 }
  0xac   : > { %v454_v39 = vmul.f32 0.00390625, %v433_v22  ;;  %v1329_v33 = vpack.c.bf16 %v456_v54, %v455_v48  ;;  %v539_v48 = vld [vmem:[%s1943_s8 + $0x8] sm:$0xff]  ;;  %v540_v54 = vld [vmem:[%s1943_s8 + $0x10] sm:$0xff] }
  0xad   : > { %v445_v49 = vpop.xlane.xlu1 %444 }
  0xae   : > { %v1326_v57 = vpack.c.bf16 %v454_v39, %v453_v27  ;;  %v458_v59 = vmul.f32 0.00390625, %v445_v49  ;;  %v538_v49 = vld [vmem:[%s1943_s8] sm:$0xff]  ;;  %v1337_v39 = vpack.c.bf16 %v1580_v29, %v1529_v12  ;;  %v1960_v12 = vpack.c.bf16 %v1566_v24, %v1525_v11  ;;  %v541_v29 = vld [vmem:[%s1943_s8 + $0x18] sm:$0xff]  ;;  %v543_v24 = vld [vmem:[%s1943_s8 + $0x28] sm:$0xff] }
  0xaf   : > { %v442_v58 = vpop.xlane.xlu0 %441  ;;  %v1961_v11 = vpack.c.bf16 %v1544_v17, %v1502_v4  ;;  %v1962_v4 = vpack.c.bf16 %v1595_v34, %v1614_v40  ;;  %v545_v17 = vld [vmem:[%s1943_s8 + $0x38] sm:$0xff]  ;;  %v688_v34 = vld [vmem:[%s1937_s2] sm:$0xf] }
  0xb0   : > { %1327 = vmatpush3.bf16.msra.mxu1 %v1326_v57  ;;  %v457_v28 = vmul.f32 0.00390625, %v442_v58  ;;  %v784_v57 = vld [vmem:[%s1940_s5 + $0x28] sm:$0xff]  ;;  %v1341_v58 = vpack.c.bf16 %v1548_v18, %v1512_v7  ;;  %v542_v7 = vld [vmem:[%s1943_s8 + $0x20] sm:$0xff]  ;;  %v1345_v18 = vpack.c.bf16 %v1599_v35, %v1618_v41  ;;  %v1349_v35 = vpack.c.bf16 %v1648_v51, %v1664_v56  ;;  %v786_v40 = vld [vmem:[%s1940_s5 + $0x38] sm:$0xff] }
  0xb1   : > { %1328 = vmatprep.subr.bf16.mxu1 %v1407_v60  ;;  %v451_v43 = vpop.xlane.xlu1 %450  ;;  %v1963_v41 = vpack.c.bf16 %v1644_v50, %v1660_v55  ;;  %v1964_v51 = vmov 0.0   ;;  %v547_v56 = vld [vmem:[%s1944_s9 + $0x8] sm:$0xff]  ;;  %v546_v50 = vld [vmem:[%s1944_s9] sm:$0xff] }
  0xb2   : > { %v1332_v42 = vpack.c.bf16 %v458_v59, %v457_v28  ;;  %v460_v61 = vmul.f32 0.00390625, %v451_v43  ;;  %v689_v28 = vld [vmem:[%s1938_s3] sm:$0xf]  ;;  %v780_v43 = vld [vmem:[%s1940_s5 + $0x8] sm:$0xff]  ;;  %v544_v59 = vld [vmem:[%s1943_s8 + $0x30] sm:$0xff] }
  0xb3   : > { %v448_v45 = vpop.xlane.xlu0 %447 }
  0xb4   : > { %1330 = vmatpush3.bf16.msra.mxu1 %v1329_v33  ;;  %v459_v44 = vmul.f32 0.00390625, %v448_v45  ;;  %v779_v33 = vld [vmem:[%s1940_s5] sm:$0xff]  ;;  %v782_v45 = vld [vmem:[%s1940_s5 + $0x18] sm:$0xff] }
  0xb5   : > { %1331 = vmatprep.subr.bf16.mxu1 %v1407_v60 }
  0xb6   : > { %v1335_v47 = vpack.c.bf16 %v460_v61, %v459_v44  ;;  %v781_v44 = vld [vmem:[%s1940_s5 + $0x10] sm:$0xff]  ;;  %v462_v61 = vld [vmem:[%s1942_s7] sm:$0xf] }
  0xb8   : > { %1333 = vmatpush3.bf16.msra.mxu1 %v1332_v42  ;;  %v1410_v42 = vmov 0  }
  0xb9   : > { %1334 = vmatprep.subr.bf16.mxu1 %v1407_v60  ;;  %1365 = vset.pattern.permute.xlu0 %v1410_v42  ;;  %v785_v60 = vld [vmem:[%s1940_s5 + $0x30] sm:$0xff] }
  0xba   : > { %1366 = vset.pattern.permute.xlu1 %v1410_v42  ;;  %692 = vperm.xlu0 %1365, %v689_v28   ;;  %v548_v42 = vld [vmem:[%s1944_s9 + $0x10] sm:$0xff] }
  0xbb   : > { %789 = vperm.xlu1 %1366, %v779_v33   ;;  %v549_v33 = vld [vmem:[%s1944_s9 + $0x18] sm:$0xff] }
  0xbc   : > { %1336 = vmatpush3.bf16.msra.mxu1 %v1335_v47  ;;  %v783_v47 = vld [vmem:[%s1940_s5 + $0x20] sm:$0xff] }
  0xbf   : > { %1309 = vmatmul.mubr.msk.f32.vlgmr.msra.gmra.mrb[0].mxu1 %vm463_vm1, %v461_v62  ;;  %794 = vperm.xlu1 %1366, %v780_v43  }
  0xc0   : > { %1313 = vmatprep.mubr.msk.f32.mxu1 %vm554_vm2, %v538_v49 }
  0xc3   : > { %799 = vperm.xlu1 %1366, %v781_v44  }
  0xc7   : > { %804 = vperm.xlu1 %1366, %v782_v45  }
  0xcb   : > { %809 = vperm.xlu1 %1366, %v783_v47  }
  0xcf   : > { %814 = vperm.xlu1 %1366, %v784_v57   ;;  %v551_v57 = vld [vmem:[%s1944_s9 + $0x28] sm:$0xff] }
  0xd3   : > { %819 = vperm.xlu1 %1366, %v785_v60   ;;  %v550_v60 = vld [vmem:[%s1944_s9 + $0x20] sm:$0xff] }
  0xd7   : > { %824 = vperm.xlu1 %1366, %v786_v40   ;;  %v775_v40 = vld [vmem:[%s1939_s4 + $0x20] sm:$0xff] }
 0x192   : > { %v533_v63 = vpop.f32.mrb[0].mxu1 }
 0x193   : > { %v534_v16 = vadd.f32 %v533_v63, %v462_v61  ;;  %v1310_v22 = vpop.f32.mrb[1].mxu1 }
 0x195   : > { %v537_v27 = vmax.f32 %v534_v16, 0.0 }
 0x197   : > { %1311 = vmatprep.subr.msk.mxu1 %vm579_vm3, %v537_v27 }
 0x198   : > { %1312 = vmatpush3.msk.msra.mxu1 %vm579_vm3, %v537_v27  ;;  %v553_v27 = vld [vmem:[%s1944_s9 + $0x38] sm:$0xff] }
 0x199   : > { %1314 = vmatmul.mubr.msk.f32.vlgmr.msra.gmra.mrb[2].mxu1 %vm554_vm2, %v539_v48  ;;  %1338 = vmatprep.subr.bf16.mxu1 %v1337_v39  ;;  %v552_v39 = vld [vmem:[%s1944_s9 + $0x30] sm:$0xff] }
 0x19a   : > { %1340 = vmatpush1.bf16.msra.mxu1 %v1960_v12  ;;  %1316 = vmatprep.mubr.msk.f32.mxu1 %vm554_vm2, %v540_v54 }
 0x19b   : > { %1342 = vmatprep.subr.bf16.mxu1 %v1341_v58 }
 0x19d   : > { %1317 = vmatmul.mubr.msk.f32.gmra.mrb[4].mxu1 %vm554_vm2, %v541_v29  ;;  %v693_v29 = vpop.permute.xlu0 %692 }
 0x19e   : > { %1344 = vmatpush1.bf16.msra.mxu1 %v1961_v11  ;;  %1319 = vmatprep.mubr.msk.f32.mxu1 %vm554_vm2, %v542_v7 }
 0x19f   : > { %1346 = vmatprep.subr.bf16.mxu1 %v1345_v18 }
 0x1a1   : > { %1320 = vmatmul.mubr.msk.f32.gmra.mrb[6].mxu1 %vm554_vm2, %v543_v24 }
 0x1a2   : > { %1348 = vmatpush1.bf16.msra.mxu1 %v1962_v4  ;;  %1322 = vmatprep.mubr.msk.f32.mxu1 %vm554_vm2, %v544_v59  ;;  %v771_v4 = vld [vmem:[%s1939_s4] sm:$0xff] }
 0x1a3   : > { %1350 = vmatprep.subr.bf16.mxu1 %v1349_v35 }
 0x1a5   : > { %1323 = vmatmul.mubr.msk.f32.gmra.mrb[8].mxu1 %vm554_vm2, %v545_v17  ;;  %v772_v17 = vld [vmem:[%s1939_s4 + $0x8] sm:$0xff] }
 0x1a6   : > { %1352 = vmatpush1.bf16.msra.mxu1 %v1963_v41  ;;  %762 = vmatprep.mubr.f32.mxu1 %v1964_v51  ;;  %v773_v41 = vld [vmem:[%s1939_s4 + $0x10] sm:$0xff] }
 0x1a9   : > { %1258 = vmatmul.mubr.msk.f32.vlgmr.msra.gmra.mrb[10].mxu1 %vm463_vm1, %v688_v34  ;;  %v774_v34 = vld [vmem:[%s1939_s4 + $0x18] sm:$0xff] }
 0x26c   : > { %v1315_v55 = vpop.f32.mrb[2].mxu1 }
 0x26d   : > { %v655_v62 = vadd.f32 %v1315_v55, %v547_v56  ;;  %v649_v49 = vpop.f32.mrb[3].mxu1  ;;  %v776_v56 = vld [vmem:[%s1939_s4 + $0x28] sm:$0xff]  ;;  %v778_v55 = vld [vmem:[%s1939_s4 + $0x38] sm:$0xff] }
 0x26e   : > { %v650_v28 = vadd.f32 %v649_v49, %v546_v50  ;;  %v777_v50 = vld [vmem:[%s1939_s4 + $0x30] sm:$0xff] }
 0x26f   : > { %977 = vperm.xlu1 %1366, %v655_v62   ;;  %v790_v62 = vpop.permute.xlu1 %789 }
 0x270   : > { %v1318_v43 = vpop.f32.mrb[4].mxu1  ;;  %972 = vperm.xlu0 %1365, %v650_v28  }
 0x271   : > { %v665_v44 = vadd.f32 %v1318_v43, %v549_v33  ;;  %v659_v45 = vpop.f32.mrb[5].mxu1 }
 0x272   : > { %v660_v47 = vadd.f32 %v659_v45, %v548_v42 }
 0x273   : > { %987 = vperm.xlu1 %1366, %v665_v44   ;;  %v795_v49 = vpop.permute.xlu1 %794 }
 0x274   : > { %v1321_v61 = vpop.f32.mrb[6].mxu1  ;;  %982 = vperm.xlu0 %1365, %v660_v47  }
 0x275   : > { %v675_v63 = vadd.f32 %v1321_v61, %v551_v57  ;;  %v669_v16 = vpop.f32.mrb[7].mxu1 }
 0x276   : > { %v670_v22 = vadd.f32 %v669_v16, %v550_v60 }
 0x277   : > { %997 = vperm.xlu1 %1366, %v675_v63   ;;  %v800_v28 = vpop.permute.xlu1 %799 }
 0x278   : > { %v1324_v48 = vpop.f32.mrb[8].mxu1  ;;  %992 = vperm.xlu0 %1365, %v670_v22  }
 0x279   : > { %v685_v54 = vadd.f32 %v1324_v48, %v553_v27  ;;  %v679_v58 = vpop.f32.mrb[9].mxu1 }
 0x27a   : > { %v680_v12 = vadd.f32 %v679_v58, %v552_v39 }
 0x27b   : > { %1007 = vperm.xlu1 %1366, %v685_v54   ;;  %v805_v33 = vpop.permute.xlu1 %804 }
 0x27c   : > { %v764_v7 = vpop.f32.mrb[10].mxu1  ;;  %1002 = vperm.xlu0 %1365, %v680_v12  }
 0x27d   : > { %v766_v18 = vpop.f32.mrb[11].mxu1  ;;  %v765_v11 = vadd.f32 %v764_v7, %v693_v29 }
 0x27e   : > { %v767_v24 = vadd.f32 %v766_v18, %v693_v29 }
 0x27f   : > { %v769_v35 = vmax.f32 %v765_v11, 0.0  ;;  %v810_v42 = vpop.permute.xlu1 %809 }
 0x280   : > { %v770_v59 = vmax.f32 %v767_v24, 0.0 }
 0x282   : > { %1259 = vmatprep.subr.msk.mxu0 %vm579_vm3, %v770_v59 }
 0x283   : > { %1260 = vmatpush1.msk.msra.mxu0 %vm579_vm3, %v769_v35  ;;  %v1832_v43 = vpop.permute.xlu1 %814 }
 0x284   : > { %1261 = vmatmul.mubr.msk.f32.vlgmr.msra.gmra.mrb[0].mxu0 %vm554_vm2, %v771_v4 }
 0x285   : > { %927 = vmatprep.mubr.f32.mxu0 %v1964_v51 }
 0x287   : > { %v1834_v44 = vpop.permute.xlu1 %819 }
 0x288   : > { %1262 = vmatmul.mubr.msk.f32.gmra.mrb[2].mxu0 %vm554_vm2, %v772_v17 }
 0x289   : > { %933 = vmatprep.mubr.f32.mxu0 %v1964_v51 }
 0x28b   : > { %v1836_v45 = vpop.permute.xlu1 %824 }
 0x28c   : > { %1263 = vmatmul.mubr.msk.f32.gmra.mrb[4].mxu0 %vm554_vm2, %v773_v41 }
 0x28d   : > { %939 = vmatprep.mubr.f32.mxu0 %v1964_v51 }
 0x290   : > { %1264 = vmatmul.mubr.msk.f32.gmra.mrb[6].mxu0 %vm554_vm2, %v774_v34 }
 0x291   : > { %945 = vmatprep.mubr.f32.mxu0 %v1964_v51 }
 0x294   : > { %1265 = vmatmul.mubr.msk.f32.gmra.mrb[8].mxu0 %vm554_vm2, %v775_v40 }
 0x295   : > { %951 = vmatprep.mubr.f32.mxu0 %v1964_v51 }
 0x298   : > { %1266 = vmatmul.mubr.msk.f32.gmra.mrb[10].mxu0 %vm554_vm2, %v776_v56 }
 0x299   : > { %957 = vmatprep.mubr.f32.mxu0 %v1964_v51 }
 0x29c   : > { %1267 = vmatmul.mubr.msk.f32.gmra.mrb[12].mxu0 %vm554_vm2, %v777_v50 }
 0x29d   : > { %963 = vmatprep.mubr.f32.mxu0 %v1964_v51 }
 0x2a0   : > { %1268 = vmatmul.mubr.msk.f32.gmra.mrb[14].mxu0 %vm554_vm2, %v778_v55 }
 0x2ee   : > { %v978_v54 = vpop.permute.xlu1 %977 }
 0x2ef   : > { %v973_v60 = vpop.permute.xlu0 %972 }
 0x2f3   : > { %v983_v35 = vpop.permute.xlu0 %982 }
 0x357   : > { %v923_v47 = vpop.f32.mrb[0].mxu0 }
 0x358   : > { %v924_v57 = vadd.f32 %v923_v47, %v790_v62  ;;  %v925_v51 = vpop.f32.mrb[1].mxu0 }
 0x359   : > { %v926_v61 = vadd.f32 %v925_v51, %v790_v62  ;;  %v988_v62 = vpop.permute.xlu1 %987  ;;  %v1095_v51 = vsub.f32 %v1492_v1, %v1498_v3 }
 0x35a   : > { %v1010_v63 = vadd.f32 %v973_v60, %v924_v57  ;;  %v1094_v57 = vsub.f32 %v1489_v0, %v1495_v2 }
 0x35b   : > { %v1011_v16 = vadd.f32 %v973_v60, %v926_v61  ;;  %v929_v22 = vpop.f32.mrb[2].mxu0  ;;  %v1091_v61 = vsub.f32 %v1508_v6, %v1518_v9 }
 0x35c   : > { %v1026_v27 = vmul.f32 0.5, %v1010_v63  ;;  %v930_v39 = vadd.f32 %v929_v22, %v795_v49  ;;  %v931_v48 = vpop.f32.mrb[3].mxu0 }
 0x35d   : > { %v1027_v58 = vmul.f32 0.5, %v1011_v16  ;;  %v932_v12 = vadd.f32 %v931_v48, %v795_v49 }
 0x35e   : > { %1367 = vtanh.f32 %v1026_v27  ;;  %v1012_v29 = vadd.f32 %v978_v54, %v930_v39  ;;  %v1097_v27 = vsub.f32 %v1532_v13, %v1538_v15 }
 0x35f   : > { %1369 = vtanh.f32 %v1027_v58  ;;  %v1013_v7 = vadd.f32 %v978_v54, %v932_v12  ;;  %v935_v18 = vpop.f32.mrb[4].mxu0  ;;  %v993_v12 = vpop.permute.xlu0 %992 }
 0x360   : > { %v1028_v11 = vmul.f32 0.5, %v1012_v29  ;;  %v936_v24 = vadd.f32 %v935_v18, %v800_v28  ;;  %v937_v59 = vpop.f32.mrb[5].mxu0  ;;  %v1093_v18 = vsub.f32 %v1554_v20, %v1562_v23 }
 0x361   : > { %v1029_v4 = vmul.f32 0.5, %v1013_v7  ;;  %v938_v17 = vadd.f32 %v937_v59, %v800_v28  ;;  %v1090_v28 = vsub.f32 %v1505_v5, %v1515_v8  ;;  %v1092_v5 = vsub.f32 %v1551_v19, %v1557_v21 }
 0x362   : > { %1371 = vtanh.f32 %v1028_v11  ;;  %v1014_v41 = vadd.f32 %v983_v35, %v936_v24  ;;  %v1098_v59 = vsub.f32 %v1589_v32, %v1605_v37  ;;  %v1099_v19 = vsub.f32 %v1602_v36, %v1608_v38 }
 0x363   : > { %1373 = vtanh.f32 %v1029_v4  ;;  %v1015_v34 = vadd.f32 %v983_v35, %v938_v17  ;;  %v941_v40 = vpop.f32.mrb[6].mxu0 }
 0x364   : > { %v1030_v56 = vmul.f32 0.5, %v1014_v41  ;;  %v942_v50 = vadd.f32 %v941_v40, %v805_v33  ;;  %v943_v55 = vpop.f32.mrb[7].mxu0 }
 0x365   : > { %v1031_v49 = vmul.f32 0.5, %v1015_v34  ;;  %v944_v47 = vadd.f32 %v943_v55, %v805_v33  ;;  %v1096_v33 = vsub.f32 %v1521_v10, %v1535_v14  ;;  %v1100_v10 = vsub.f32 %v1569_v25, %v1583_v30 }
 0x366   : > { %1375 = vtanh.f32 %v1030_v56  ;;  %v1016_v60 = vadd.f32 %v988_v62, %v942_v50  ;;  %v998_v50 = vpop.permute.xlu1 %997 }
 0x367   : > { %1377 = vtanh.f32 %v1031_v49  ;;  %v1017_v63 = vadd.f32 %v988_v62, %v944_v47  ;;  %v947_v16 = vpop.f32.mrb[8].mxu0 }
 0x368   : > { %v1368_v22 = vpop.eup %1367  ;;  %v1032_v39 = vmul.f32 0.5, %v1016_v60  ;;  %v948_v48 = vadd.f32 %v947_v16, %v810_v42  ;;  %v949_v54 = vpop.f32.mrb[9].mxu0 }
 0x369   : > { %v1370_v58 = vpop.eup %1369  ;;  %v1058_v29 = vmul.f32 0.5, %v1368_v22  ;;  %v1033_v6 = vmul.f32 0.5, %v1017_v63  ;;  %v950_v7 = vadd.f32 %v949_v54, %v810_v42 }
 0x36a   : > { %v1059_v11 = vmul.f32 0.5, %v1370_v58  ;;  %1379 = vtanh.f32 %v1032_v39  ;;  %v1018_v24 = vadd.f32 %v993_v12, %v948_v48 }
 0x36b   : > { %v1074_v35 = vadd.f32 0.5, %v1058_v29  ;;  %1381 = vtanh.f32 %v1033_v6  ;;  %v1019_v4 = vadd.f32 %v993_v12, %v950_v7  ;;  %v953_v17 = vpop.f32.mrb[10].mxu0 }
 0x36c   : > { %v1372_v41 = vpop.eup %1371  ;;  %v1075_v34 = vadd.f32 0.5, %v1059_v11  ;;  %v1034_v40 = vmul.f32 0.5, %v1018_v24  ;;  %v954_v42 = vadd.f32 %v953_v17, %v1832_v43  ;;  %v955_v56 = vpop.f32.mrb[11].mxu0 }
 0x36d   : > { %v1374_v20 = vpop.eup %1373  ;;  %v1106_v55 = vmul.f32 %v1090_v28, %v1074_v35  ;;  %v1060_v62 = vmul.f32 0.5, %v1372_v41  ;;  %v1035_v49 = vmul.f32 0.5, %v1019_v4  ;;  %v956_v47 = vadd.f32 %v955_v56, %v1832_v43  ;;  %v1003_v35 = vpop.permute.xlu0 %1002 }
 0x36e   : > { %v1107_v60 = vmul.f32 %v1091_v61, %v1075_v34  ;;  %v1061_v63 = vmul.f32 0.5, %v1374_v20  ;;  %1383 = vtanh.f32 %v1034_v40  ;;  %v1020_v16 = vadd.f32 %v998_v50, %v954_v42 }
 0x36f   : > { %v1122_v22 = vadd.f32 %v1106_v55, %v1515_v8  ;;  %v1076_v39 = vadd.f32 0.5, %v1060_v62  ;;  %1385 = vtanh.f32 %v1035_v49  ;;  %v1021_v48 = vadd.f32 %v998_v50, %v956_v47  ;;  %v959_v54 = vpop.f32.mrb[12].mxu0 }
 0x370   : > { %v1376_v58 = vpop.eup %1375  ;;  %v1123_v28 = vadd.f32 %v1107_v60, %v1518_v9  ;;  %v1077_v43 = vadd.f32 0.5, %v1061_v63  ;;  %v1036_v61 = vmul.f32 0.5, %v1020_v16  ;;  %v960_v12 = vadd.f32 %v959_v54, %v1834_v44  ;;  %v961_v29 = vpop.f32.mrb[13].mxu0 }
 0x371   : > { %v1378_v6 = vpop.eup %1377  ;;  %v1138_v8 = vmul.f32 2.0, %v1122_v22  ;;  %v1108_v7 = vmul.f32 %v1092_v5, %v1076_v39  ;;  %v1062_v11 = vmul.f32 0.5, %v1376_v58  ;;  %v1037_v24 = vmul.f32 0.5, %v1021_v48  ;;  %v1008_v63 = vpop.permute.xlu1 %1007 }
 0x372   : > { %v1139_v4 = vmul.f32 2.0, %v1123_v28  ;;  %v1109_v17 = vmul.f32 %v1093_v18, %v1077_v43  ;;  %v1063_v41 = vmul.f32 0.5, %v1378_v6  ;;  %1387 = vtanh.f32 %v1036_v61 }
 0x373   : > { %1154 = vst [vmem:[%s1865_s24] sm:$0xff] %v1138_v8  ;;  %v1124_v34 = vadd.f32 %v1108_v7, %v1557_v21  ;;  %v1078_v9 = vadd.f32 0.5, %v1062_v11  ;;  %1389 = vtanh.f32 %v1037_v24  ;;  %v1022_v40 = vadd.f32 %v1003_v35, %v960_v12  ;;  %v965_v42 = vpop.f32.mrb[14].mxu0 }
 0x374   : > { %v1380_v56 = vpop.eup %1379  ;;  %1155 = vst [vmem:[%s1865_s24 + $0x8] sm:$0xff] %v1139_v4  ;;  %v1125_v20 = vadd.f32 %v1109_v17, %v1562_v23  ;;  %v1079_v5 = vadd.f32 0.5, %v1063_v41  ;;  %v962_v50 = vadd.f32 %v961_v29, %v1834_v44  ;;  %v966_v55 = vadd.f32 %v965_v42, %v1836_v45  ;;  %v967_v18 = vpop.f32.mrb[15].mxu0 }
 0x375   : > { %v1382_v62 = vpop.eup %1381  ;;  %v1140_v49 = vmul.f32 2.0, %v1124_v34  ;;  %v1110_v21 = vmul.f32 %v1094_v57, %v1078_v9  ;;  %v1064_v47 = vmul.f32 0.5, %v1380_v56  ;;  %v1038_v60 = vmul.f32 0.5, %v1022_v40 }
 0x376   : > { %v1141_v16 = vmul.f32 2.0, %v1125_v20  ;;  %v1111_v23 = vmul.f32 %v1095_v51, %v1079_v5  ;;  %v1065_v22 = vmul.f32 0.5, %v1382_v62  ;;  %v1023_v44 = vadd.f32 %v1003_v35, %v962_v50 }
 0x377   : > { %1156 = vst [vmem:[%s1865_s24 + $0x10] sm:$0xff] %v1140_v49  ;;  %v1126_v39 = vadd.f32 %v1110_v21, %v1495_v2  ;;  %v1080_v48 = vadd.f32 0.5, %v1064_v47  ;;  %1391 = vtanh.f32 %v1038_v60  ;;  %v1024_v54 = vadd.f32 %v1008_v63, %v966_v55  ;;  %v1967_v47 = vld [vmem:[#allocation2_spill] sm:$0xff] }
 0x378   : > { %v1384_v58 = vpop.eup %1383  ;;  %1157 = vst [vmem:[%s1865_s24 + $0x18] sm:$0xff] %v1141_v16  ;;  %v1127_v0 = vadd.f32 %v1111_v23, %v1498_v3  ;;  %v1081_v57 = vadd.f32 0.5, %v1065_v22  ;;  %v1039_v28 = vmul.f32 0.5, %v1023_v44  ;;  %v968_v43 = vadd.f32 %v967_v18, %v1836_v45  ;;  %v1965_v18 = vld [vmem:[#allocation6_spill] sm:$0xff] }
 0x379   : > { %v1386_v61 = vpop.eup %1385  ;;  %v1142_v1 = vmul.f32 2.0, %v1126_v39  ;;  %v1112_v51 = vmul.f32 %v1096_v33, %v1080_v48  ;;  %v1066_v2 = vmul.f32 0.5, %v1384_v58  ;;  %v1040_v12 = vmul.f32 0.5, %v1024_v54  ;;  %v1968_v48 = vld [vmem:[#allocation5_spill] sm:$0xff]  ;;  %v1969_v54 = vld [vmem:[#allocation3_spill] sm:$0xff] }
 0x37a   : > { %v1143_v29 = vmul.f32 2.0, %v1127_v0  ;;  %v1113_v6 = vmul.f32 %v1097_v27, %v1081_v57  ;;  %v1067_v8 = vmul.f32 0.5, %v1386_v61  ;;  %1393 = vtanh.f32 %v1039_v28 }
 0x37b   : > { %1158 = vst [vmem:[%s1865_s24 + $0x20] sm:$0xff] %v1142_v1  ;;  %v1128_v3 = vadd.f32 %v1112_v51, %v1535_v14  ;;  %v1082_v45 = vadd.f32 0.5, %v1066_v2  ;;  %1395 = vtanh.f32 %v1040_v12  ;;  %v1025_v7 = vadd.f32 %v1008_v63, %v968_v43 }
 0x37c   : > { %v1388_v11 = vpop.eup %1387  ;;  %1159 = vst [vmem:[%s1865_s24 + $0x28] sm:$0xff] %v1143_v29  ;;  %v1129_v33 = vadd.f32 %v1113_v6, %v1538_v15  ;;  %v1083_v24 = vadd.f32 0.5, %v1067_v8  ;;  %v1101_v17 = vsub.f32 %v1572_v26, %v1586_v31  ;;  %v1102_v56 = vsub.f32 %v1633_v46, %v1651_v52  ;;  %v1966_v46 = vld [vmem:[#allocation4_spill] sm:$0xff] }
 0x37d   : > { %v1390_v13 = vpop.eup %1389  ;;  %v1144_v27 = vmul.f32 2.0, %v1128_v3  ;;  %v1114_v35 = vmul.f32 %v1098_v59, %v1082_v45  ;;  %v1068_v14 = vmul.f32 0.5, %v1388_v11  ;;  %v1041_v4 = vmul.f32 0.5, %v1025_v7 }
 0x37e   : > { %v1145_v41 = vmul.f32 2.0, %v1129_v33  ;;  %v1115_v25 = vmul.f32 %v1099_v19, %v1083_v24  ;;  %v1069_v34 = vmul.f32 0.5, %v1390_v13  ;;  %v1103_v62 = vsub.f32 %v1965_v18, %v1654_v53 }
 0x37f   : > { %1160 = vst [vmem:[%s1865_s24 + $0x30] sm:$0xff] %v1144_v27  ;;  %v1130_v15 = vadd.f32 %v1114_v35, %v1605_v37  ;;  %v1084_v9 = vadd.f32 0.5, %v1068_v14  ;;  %1397 = vtanh.f32 %v1041_v4  ;;  %v1104_v60 = vsub.f32 %v1967_v47, %v1966_v46 }
 0x380   : > { %1161 = vst [vmem:[%s1865_s24 + $0x38] sm:$0xff] %v1145_v41  ;;  %v1131_v32 = vadd.f32 %v1115_v25, %v1608_v38  ;;  %v1085_v59 = vadd.f32 0.5, %v1069_v34  ;;  %v1105_v58 = vsub.f32 %v1969_v54, %v1968_v48 }
 0x381   : > { %v1392_v40 = vpop.eup %1391  ;;  %v1146_v42 = vmul.f32 2.0, %v1130_v15  ;;  %v1116_v26 = vmul.f32 %v1100_v10, %v1084_v9 }
 0x382   : > { %v1147_v36 = vmul.f32 2.0, %v1131_v32  ;;  %v1117_v19 = vmul.f32 %v1101_v17, %v1085_v59  ;;  %v1070_v20 = vmul.f32 0.5, %v1392_v40 }
 0x383   : > { %1162 = vst [vmem:[%s1865_s24 + $0x40] sm:$0xff] %v1146_v42  ;;  %v1132_v37 = vadd.f32 %v1116_v26, %v1583_v30 }
 0x384   : > { %v1394_v5 = vpop.eup %1393  ;;  %1163 = vst [vmem:[%s1865_s24 + $0x48] sm:$0xff] %v1147_v36  ;;  %v1133_v50 = vadd.f32 %v1117_v19, %v1586_v31  ;;  %v1086_v38 = vadd.f32 0.5, %v1070_v20 }
 0x385   : > { %v1396_v55 = vpop.eup %1395  ;;  %v1148_v49 = vmul.f32 2.0, %v1132_v37  ;;  %v1071_v21 = vmul.f32 0.5, %v1394_v5 }
 0x386   : > { %v1149_v63 = vmul.f32 2.0, %v1133_v50  ;;  %v1118_v16 = vmul.f32 %v1102_v56, %v1086_v38  ;;  %v1072_v23 = vmul.f32 0.5, %v1396_v55 }
 0x387   : > { %1164 = vst [vmem:[%s1865_s24 + $0x50] sm:$0xff] %v1148_v49  ;;  %v1087_v30 = vadd.f32 0.5, %v1071_v21 }
 0x388   : > { %1165 = vst [vmem:[%s1865_s24 + $0x58] sm:$0xff] %v1149_v63  ;;  %v1134_v31 = vadd.f32 %v1118_v16, %v1651_v52  ;;  %v1088_v22 = vadd.f32 0.5, %v1072_v23 }
 0x389   : > { %v1398_v44 = vpop.eup %1397  ;;  %v1119_v39 = vmul.f32 %v1103_v62, %v1087_v30 }
 0x38a   : > { %v1150_v0 = vmul.f32 2.0, %v1134_v31  ;;  %v1120_v57 = vmul.f32 %v1104_v60, %v1088_v22  ;;  %v1073_v28 = vmul.f32 0.5, %v1398_v44 }
 0x38b   : > { %v1135_v43 = vadd.f32 %v1119_v39, %v1654_v53 }
 0x38c   : > { %1166 = vst [vmem:[%s1865_s24 + $0x60] sm:$0xff] %v1150_v0  ;;  %v1136_v61 = vadd.f32 %v1120_v57, %v1966_v46  ;;  %v1089_v1 = vadd.f32 0.5, %v1073_v28 }
 0x38d   : > { %v1151_v51 = vmul.f32 2.0, %v1135_v43 }
 0x38e   : > { %v1152_v2 = vmul.f32 2.0, %v1136_v61  ;;  %v1121_v52 = vmul.f32 %v1105_v58, %v1089_v1 }
 0x38f   : > { %1167 = vst [vmem:[%s1865_s24 + $0x68] sm:$0xff] %v1151_v51 }
 0x390   : > { %1168 = vst [vmem:[%s1865_s24 + $0x70] sm:$0xff] %v1152_v2  ;;  %v1137_v12 = vadd.f32 %v1121_v52, %v1968_v48 }
 0x392   : > { %v1153_v29 = vmul.f32 2.0, %v1137_v12 }
 0x394   : > { %1169 = vst [vmem:[%s1865_s24 + $0x78] sm:$0xff] %v1153_v29 }
 0x395 PF: > { %s20_s13 = sadd.s32 1, %s1405_s13  }
 0x396   : > { %p17_p4 = scmp.ge.s32.totalorder %s20_s13, 4  }
 0x398   :  { %19 = sbr.rel (!%p17_p4) target bundleno = 1 (0x1), region = 93 }

</bundles_post_ra>
